<compile_context>
chip_gen: v5e
topology: v5e:2x2
jax: 0.10.0
libtpu: 0.0.40
codegen_flags: <defaults>
</compile_context>

<pallas_src>
import functools

import numpy as np
import jax
import jax.numpy as jnp
from jax import lax
from jax.experimental import pallas as pl
from jax.experimental.pallas import tpu as pltpu

_LANES = 128
_PAIR = 2 * _LANES          # the hot loop consumes lane-chunks in pairs
_MAX_TILE = 65536           # upper cap on lanes per grid step


def _round_up(x, m):
    return ((x + m - 1) // m) * m


def _cdiv(a, b):
    return (a + b - 1) // b


def _tpu_generation():
    try:
        kind = jax.devices()[0].device_kind.lower()
    except Exception:
        return "unknown"
    if "v5 lite" in kind or "v5e" in kind or "v5litepod" in kind:
        return "v5e"
    if "v6" in kind:
        return "v6e"
    if "v7" in kind or "7x" in kind:
        return "v7x"
    return "unknown"


def _tpu_limits():
    """Returns (n_parallel, input working-set budget, vmem cap) per generation."""
    table = {
        "v5e": (1, 12 << 20, 100 << 20),   # 1 TC, 128 MiB physical VMEM
        "v6e": (1, 16 << 20, 100 << 20),   # 1 TC, 128 MiB physical VMEM
        "v7x": (2, 10 << 20, 52 << 20),    # 2 TCs, 64 MiB physical VMEM / TC
    }
    n_par, budget, cap = table.get(_tpu_generation(), (2, 8 << 20, 48 << 20))
    try:  # refine with the queried per-core VMEM capacity when available
        phys = int(pltpu.get_tpu_info().vmem_capacity_bytes)
        cap = min(cap, max(phys - (12 << 20), 16 << 20))
        budget = min(budget, cap // 4)
    except Exception:
        pass
    return n_par, budget, cap


def _gdl_partial_kernel(p_ref, g_ref, gsum_ref, pg_ref, psum_ref, *,
                        n_pairs, tile_lanes, tiles_per_p, valid_len, unroll):
    """Accumulate lane-shaped partial sums of g, p*g and p over one spatial tile."""
    pi = pl.program_id(0)
    t = pl.program_id(1)

    @pl.when(t == 0)
    def _():
        gsum_ref[...] = jnp.zeros_like(gsum_ref)
        pg_ref[...] = jnp.zeros_like(pg_ref)
        psum_ref[...] = jnp.zeros_like(psum_ref)

    rows = gsum_ref.shape[1]
    # Logical (unclamped) element offset of this tile; used for tail masking.
    tile_start = (pi * tiles_per_p + t) * tile_lanes
    zeros = jnp.zeros((rows, _LANES), jnp.float32)

    def _accumulate(body):
        gs, pgs, ps = lax.fori_loop(0, n_pairs, body, (zeros, zeros, zeros),
                                    unroll=unroll)
        gsum_ref[0] += gs
        pg_ref[0] += pgs
        psum_ref[0] += ps

    full_valid = tile_start + tile_lanes <= valid_len

    @pl.when(full_valid)
    def _():
        # Fast path: no masking; pure-VPU adds/mul, pairwise-added before the
        # accumulator RMW.
        def body(j, carry):
            gs, pgs, ps = carry
            lo0 = pl.multiple_of(j * _PAIR, _LANES)
            lo1 = pl.multiple_of(j * _PAIR + _LANES, _LANES)
            p0 = p_ref[:, pl.ds(lo0, _LANES)].astype(jnp.float32)
            g0 = g_ref[:, pl.ds(lo0, _LANES)].astype(jnp.float32)
            p1 = p_ref[:, pl.ds(lo1, _LANES)].astype(jnp.float32)
            g1 = g_ref[:, pl.ds(lo1, _LANES)].astype(jnp.float32)
            return (gs + (g0 + g1), pgs + (p0 * g0 + p1 * g1), ps + (p0 + p1))
        _accumulate(body)

    @pl.when(jnp.logical_not(full_valid))
    def _():
        # Boundary / out-of-range tile: mask lanes past the true spatial length
        # (the buffer contents beyond it are undefined).
        lane_ids = lax.broadcasted_iota(jnp.int32, (rows, _LANES), 1)

        def body(j, carry):
            gs, pgs, ps = carry
            lo0 = pl.multiple_of(j * _PAIR, _LANES)
            lo1 = pl.multiple_of(j * _PAIR + _LANES, _LANES)
            m0 = (lane_ids + (tile_start + j * _PAIR)) < valid_len
            m1 = (lane_ids + (tile_start + j * _PAIR + _LANES)) < valid_len
            p0 = jnp.where(m0, p_ref[:, pl.ds(lo0, _LANES)].astype(jnp.float32), 0.0)
            g0 = jnp.where(m0, g_ref[:, pl.ds(lo0, _LANES)].astype(jnp.float32), 0.0)
            p1 = jnp.where(m1, p_ref[:, pl.ds(lo1, _LANES)].astype(jnp.float32), 0.0)
            g1 = jnp.where(m1, g_ref[:, pl.ds(lo1, _LANES)].astype(jnp.float32), 0.0)
            return (gs + (g0 + g1), pgs + (p0 * g0 + p1 * g1), ps + (p0 + p1))
        _accumulate(body)


def generalized_dice_loss(p, g, *, n_dims, batch_dice=False, smooth=1e-5):
    assert n_dims in (1, 2, 3)
    assert p.shape == g.shape and p.ndim == n_dims + 2
    B, C = int(p.shape[0]), int(p.shape[1])
    S = 1
    for d in p.shape[2:]:
        S *= int(d)
    BC = B * C

    # Fold a small spatial factor onto sublanes so tiny B*C does not waste
    # vreg sublanes / DMA bandwidth (exact: summed back out in the epilogue).
    pack = 1
    if BC < 8:
        for k in range(2, 17):
            if S % k == 0 and BC * k >= 8:
                pack = k
                break
    rows = BC * pack
    Sk = S // pack

    p2 = jnp.reshape(p, (rows, Sk))
    g2 = jnp.reshape(g, (rows, Sk))

    n_par, vmem_budget, vmem_cap = _tpu_limits()

    # Tiny spatial extents: pad to one 256-lane tile (a few KiB at most) so a
    # block never exceeds the array's lane extent.  Larger ragged extents are
    # masked in-kernel -- no extra HBM pass.
    if Sk < _PAIR:
        p2 = jnp.pad(p2, ((0, 0), (0, _PAIR - Sk)))
        g2 = jnp.pad(g2, ((0, 0), (0, _PAIR - Sk)))
        s_arr = _PAIR
    else:
        s_arr = Sk

    # Tile size: as large as the VMEM budget allows (double-buffered inputs),
    # multiple of 256 lanes, never exceeding the array's lane extent.
    ip, ig = p2.dtype.itemsize, g2.dtype.itemsize
    per_lane = _round_up(rows, 8) * (ip + ig)
    ts = (vmem_budget // (2 * per_lane)) // _PAIR * _PAIR
    ts = max(_PAIR, min(ts, _MAX_TILE, (s_arr // _PAIR) * _PAIR))

    n_total = _cdiv(s_arr, ts)
    n_par = max(1, min(n_par, n_total))
    tiles_per_p = _cdiv(n_total, n_par)
    n_pairs = ts // _PAIR
    unroll = max(1, min(4, n_pairs))

    kernel = functools.partial(
        _gdl_partial_kernel, n_pairs=n_pairs, tile_lanes=ts,
        tiles_per_p=tiles_per_p, valid_len=Sk, unroll=unroll)

    last_blk = n_total - 1

    def in_map(pi, t):
        # Clamp so an over-allocated trailing tile never DMAs out of range;
        # its contribution is fully masked out in the kernel.
        return (0, jnp.minimum(pi * tiles_per_p + t, last_blk))

    acc_shape = jax.ShapeDtypeStruct((n_par, rows, _LANES), jnp.float32)
    acc_spec = pl.BlockSpec((1, rows, _LANES), lambda pi, t: (pi, 0, 0))
    in_spec = pl.BlockSpec((rows, ts), in_map)

    in_ws = 2 * _round_up(rows, 8) * ts * (ip + ig)           # double-buffered
    out_ws = 3 * 2 * _round_up(rows, 8) * _LANES * 4
    vmem_limit = int(min(vmem_cap, max(32 << 20, in_ws + out_ws + (6 << 20))))

    cost = pl.CostEstimate(
        flops=5 * rows * s_arr,
        transcendentals=0,
        bytes_accessed=rows * s_arr * (ip + ig) + 3 * n_par * rows * _LANES * 4)

    gsum_p, pg_p, psum_p = pl.pallas_call(
        kernel,
        out_shape=(acc_shape, acc_shape, acc_shape),
        grid_spec=pltpu.PrefetchScalarGridSpec(
            num_scalar_prefetch=0,
            grid=(n_par, tiles_per_p),
            in_specs=[in_spec, in_spec],
            out_specs=[acc_spec, acc_spec, acc_spec],
        ),
        compiler_params=pltpu.CompilerParams(
            dimension_semantics=("parallel", "arbitrary"),
            vmem_limit_bytes=vmem_limit),
        cost_estimate=cost,
    )(p2, g2)

    # ---- tiny O(B*C) weighted-dice combine (plain JAX epilogue) --------------
    gsum = jnp.sum(gsum_p, axis=(0, 2)).reshape(B, C, pack).sum(-1)
    pg = jnp.sum(pg_p, axis=(0, 2)).reshape(B, C, pack).sum(-1)
    pplusg = jnp.sum(psum_p, axis=(0, 2)).reshape(B, C, pack).sum(-1) + gsum
    if batch_dice:
        gsum = jnp.sum(gsum, axis=0, keepdims=True)
        pg = jnp.sum(pg, axis=0, keepdims=True)
        pplusg = jnp.sum(pplusg, axis=0, keepdims=True)
    w = 1.0 / (gsum + smooth) ** 2
    num = jnp.sum(w * pg, axis=-1)
    den = jnp.sum(w * pplusg, axis=-1)
    dice = jnp.mean((2.0 * num + smooth) / (den + smooth))
    return 1.0 - dice


def _reference_loss(p, g, *, n_dims, batch_dice=False, smooth=1e-5):
    # Pure-JAX reference matching the PyTorch module semantics.
    sum_dims = tuple(range(2, n_dims + 2))
    if batch_dice:
        sum_dims = (0,) + sum_dims
    w = 1.0 / (jnp.sum(g, axis=sum_dims) + smooth) ** 2
    num = jnp.sum(w * jnp.sum(p * g, axis=sum_dims), axis=-1)
    den = jnp.sum(w * jnp.sum(p + g, axis=sum_dims), axis=-1)
    dice = jnp.mean((2.0 * num + smooth) / (den + smooth))
    return 1.0 - dice


if __name__ == "__main__":
    key = jax.random.PRNGKey(0)
    k1, k2, k3, k4 = jax.random.split(key, 4)

    # Test 1: nDims=2 -> (B, C, H, W) = (2, 4, 16, 16), f32, batchDice=False.
    B, C, H, W = 2, 4, 16, 16
    p = jax.random.uniform(k1, (B, C, H, W), dtype=jnp.float32)
    labels = jax.random.randint(k2, (B, H, W), 0, C)
    g = jnp.transpose(jax.nn.one_hot(labels, C, dtype=jnp.float32), (0, 3, 1, 2))
    loss = jax.block_until_ready(
        generalized_dice_loss(p, g, n_dims=2, batch_dice=False, smooth=1e-5))
    ref = jax.block_until_ready(
        _reference_loss(p, g, n_dims=2, batch_dice=False, smooth=1e-5))
    np.testing.assert_allclose(np.asarray(loss), np.asarray(ref),
                               rtol=1e-5, atol=1e-6)

    # Test 2: ragged spatial extent + small channel count + bf16 predictions
    # (exercises in-kernel tail masking, sublane packing, batchDice=True).
    B2, C2, H2, W2 = 2, 3, 20, 30
    pb = jax.random.uniform(k3, (B2, C2, H2, W2), dtype=jnp.float32)
    pb = pb.astype(jnp.bfloat16)
    labels2 = jax.random.randint(k4, (B2, H2, W2), 0, C2)
    gb = jnp.transpose(jax.nn.one_hot(labels2, C2, dtype=jnp.float32), (0, 3, 1, 2))
    loss2 = jax.block_until_ready(
        generalized_dice_loss(pb, gb, n_dims=2, batch_dice=True, smooth=1e-5))
    ref2 = jax.block_until_ready(
        _reference_loss(pb.astype(jnp.float32), gb, n_dims=2, batch_dice=True,
                        smooth=1e-5))
    np.testing.assert_allclose(np.asarray(loss2), np.asarray(ref2),
                               rtol=1e-4, atol=1e-5)

    print("KERNEL_OK")
</pallas_src>

<mosaic_0001>
module attributes {stable_mosaic.version = 11 : i64} {
  func.func @_gdl_partial_kernel(%arg0: i32, %arg1: i32, %arg2: memref<8x256xf32, #tpu.memory_space<vmem>>, %arg3: memref<8x256xf32, #tpu.memory_space<vmem>>, %arg4: memref<1x8x128xf32, #tpu.memory_space<vmem>>, %arg5: memref<1x8x128xf32, #tpu.memory_space<vmem>>, %arg6: memref<1x8x128xf32, #tpu.memory_space<vmem>>) attributes {dimension_semantics = [#tpu.dimension_semantics<parallel>, #tpu.dimension_semantics<arbitrary>], iteration_bounds = array<i64: 1, 1>, scalar_prefetch = 0 : i64, scratch_operands = 0 : i64, tpu.core_type = #tpu.core_type<tc>, window_params = [{transform_indices = @transform_0, window_bounds = array<i64: 8, 256>}, {transform_indices = @transform_1, window_bounds = array<i64: 8, 256>}, {transform_indices = @transform_2, window_bounds = array<i64: 1, 8, 128>}, {transform_indices = @transform_3, window_bounds = array<i64: 1, 8, 128>}, {transform_indices = @transform_4, window_bounds = array<i64: 1, 8, 128>}]} {
    %c0_i32 = arith.constant 0 : i32
    %0 = arith.cmpi eq, %arg1, %c0_i32 : i32
    %1 = arith.extui %0 : i1 to i32
    %c0_i32_0 = arith.constant 0 : i32
    %2 = arith.cmpi ne, %1, %c0_i32_0 : i32
    scf.if %2 {
      %cst_5 = arith.constant 0.000000e+00 : f32
      %14 = vector.broadcast %cst_5 : f32 to vector<1x8x128xf32>
      %c0 = arith.constant 0 : index
      %c0_6 = arith.constant 0 : index
      %c0_7 = arith.constant 0 : index
      %15 = vector.load %arg4[%c0, %c0_6, %c0_7] : memref<1x8x128xf32, #tpu.memory_space<vmem>>, vector<1x8x128xf32>
      tpu.vector_store %arg4[%c0, %c0_6, %c0_7], %14 {strides = array<i32>} : memref<1x8x128xf32, #tpu.memory_space<vmem>>, vector<1x8x128xf32>,
      %cst_8 = arith.constant 0.000000e+00 : f32
      %16 = vector.broadcast %cst_8 : f32 to vector<1x8x128xf32>
      %c0_9 = arith.constant 0 : index
      %c0_10 = arith.constant 0 : index
      %c0_11 = arith.constant 0 : index
      %17 = vector.load %arg5[%c0_9, %c0_10, %c0_11] : memref<1x8x128xf32, #tpu.memory_space<vmem>>, vector<1x8x128xf32>
      tpu.vector_store %arg5[%c0_9, %c0_10, %c0_11], %16 {strides = array<i32>} : memref<1x8x128xf32, #tpu.memory_space<vmem>>, vector<1x8x128xf32>,
      %cst_12 = arith.constant 0.000000e+00 : f32
      %18 = vector.broadcast %cst_12 : f32 to vector<1x8x128xf32>
      %c0_13 = arith.constant 0 : index
      %c0_14 = arith.constant 0 : index
      %c0_15 = arith.constant 0 : index
      %19 = vector.load %arg6[%c0_13, %c0_14, %c0_15] : memref<1x8x128xf32, #tpu.memory_space<vmem>>, vector<1x8x128xf32>
      tpu.vector_store %arg6[%c0_13, %c0_14, %c0_15], %18 {strides = array<i32>} : memref<1x8x128xf32, #tpu.memory_space<vmem>>, vector<1x8x128xf32>,
    } else {
    }
    %c1_i32 = arith.constant 1 : i32
    %3 = arith.muli %arg0, %c1_i32 : i32
    %4 = arith.addi %3, %arg1 : i32
    %c256_i32 = arith.constant 256 : i32
    %5 = arith.muli %4, %c256_i32 : i32
    %cst = arith.constant 0.000000e+00 : f32
    %6 = vector.broadcast %cst : f32 to vector<8x128xf32>
    %c256_i32_1 = arith.constant 256 : i32
    %7 = arith.addi %5, %c256_i32_1 : i32
    %c256_i32_2 = arith.constant 256 : i32
    %8 = arith.cmpi sle, %7, %c256_i32_2 : i32
    %9 = arith.extui %8 : i1 to i32
    %c0_i32_3 = arith.constant 0 : i32
    %10 = arith.cmpi ne, %9, %c0_i32_3 : i32
    scf.if %10 {
      %c0_i32_5 = arith.constant 0 : i32
      %c256_i32_6 = arith.constant 256 : i32
      %14 = arith.muli %c0_i32_5, %c256_i32_6 : i32
      %15 = tpu.assume_multiple %14, 128 : i32
      %c256_i32_7 = arith.constant 256 : i32
      %16 = arith.muli %c0_i32_5, %c256_i32_7 : i32
      %c128_i32 = arith.constant 128 : i32
      %17 = arith.addi %16, %c128_i32 : i32
      %18 = tpu.assume_multiple %17, 128 : i32
      %c0 = arith.constant 0 : index
      %19 = arith.index_cast %15 : i32 to index
      %20 = vector.load %arg2[%c0, %19] : memref<8x256xf32, #tpu.memory_space<vmem>>, vector<8x128xf32>
      %c0_8 = arith.constant 0 : index
      %21 = arith.index_cast %15 : i32 to index
      %22 = vector.load %arg3[%c0_8, %21] : memref<8x256xf32, #tpu.memory_space<vmem>>, vector<8x128xf32>
      %c0_9 = arith.constant 0 : index
      %23 = arith.index_cast %18 : i32 to index
      %24 = vector.load %arg2[%c0_9, %23] : memref<8x256xf32, #tpu.memory_space<vmem>>, vector<8x128xf32>
      %c0_10 = arith.constant 0 : index
      %25 = arith.index_cast %18 : i32 to index
      %26 = vector.load %arg3[%c0_10, %25] : memref<8x256xf32, #tpu.memory_space<vmem>>, vector<8x128xf32>
      %27 = arith.addf %22, %26 : vector<8x128xf32>
      %28 = arith.addf %6, %27 : vector<8x128xf32>
      %29 = arith.mulf %20, %22 : vector<8x128xf32>
      %30 = arith.mulf %24, %26 : vector<8x128xf32>
      %31 = arith.addf %29, %30 : vector<8x128xf32>
      %32 = arith.addf %6, %31 : vector<8x128xf32>
      %33 = arith.addf %20, %24 : vector<8x128xf32>
      %34 = arith.addf %6, %33 : vector<8x128xf32>
      %c1_i32_11 = arith.constant 1 : i32
      %c0_12 = arith.constant 0 : index
      %c0_13 = arith.constant 0 : index
      %c0_14 = arith.constant 0 : index
      %35 = vector.load %arg4[%c0_12, %c0_13, %c0_14] : memref<1x8x128xf32, #tpu.memory_space<vmem>>, vector<1x8x128xf32>
      %36 = vector.shape_cast %35 : vector<1x8x128xf32> to vector<8x128xf32>
      %37 = arith.addf %36, %28 : vector<8x128xf32>
      %c0_15 = arith.constant 0 : index
      %c0_16 = arith.constant 0 : index
      %c0_17 = arith.constant 0 : index
      %38 = vector.load %arg4[%c0_15, %c0_16, %c0_17] : memref<1x8x128xf32, #tpu.memory_space<vmem>>, vector<1x8x128xf32>
      %39 = vector.shape_cast %38 : vector<1x8x128xf32> to vector<8x128xf32>
      %40 = vector.shape_cast %37 : vector<8x128xf32> to vector<1x8x128xf32>
      tpu.vector_store %arg4[%c0_15, %c0_16, %c0_17], %40 {strides = array<i32>} : memref<1x8x128xf32, #tpu.memory_space<vmem>>, vector<1x8x128xf32>,
      %c0_18 = arith.constant 0 : index
      %c0_19 = arith.constant 0 : index
      %c0_20 = arith.constant 0 : index
      %41 = vector.load %arg5[%c0_18, %c0_19, %c0_20] : memref<1x8x128xf32, #tpu.memory_space<vmem>>, vector<1x8x128xf32>
      %42 = vector.shape_cast %41 : vector<1x8x128xf32> to vector<8x128xf32>
      %43 = arith.addf %42, %32 : vector<8x128xf32>
      %c0_21 = arith.constant 0 : index
      %c0_22 = arith.constant 0 : index
      %c0_23 = arith.constant 0 : index
      %44 = vector.load %arg5[%c0_21, %c0_22, %c0_23] : memref<1x8x128xf32, #tpu.memory_space<vmem>>, vector<1x8x128xf32>
      %45 = vector.shape_cast %44 : vector<1x8x128xf32> to vector<8x128xf32>
      %46 = vector.shape_cast %43 : vector<8x128xf32> to vector<1x8x128xf32>
      tpu.vector_store %arg5[%c0_21, %c0_22, %c0_23], %46 {strides = array<i32>} : memref<1x8x128xf32, #tpu.memory_space<vmem>>, vector<1x8x128xf32>,
      %c0_24 = arith.constant 0 : index
      %c0_25 = arith.constant 0 : index
      %c0_26 = arith.constant 0 : index
      %47 = vector.load %arg6[%c0_24, %c0_25, %c0_26] : memref<1x8x128xf32, #tpu.memory_space<vmem>>, vector<1x8x128xf32>
      %48 = vector.shape_cast %47 : vector<1x8x128xf32> to vector<8x128xf32>
      %49 = arith.addf %48, %34 : vector<8x128xf32>
      %c0_27 = arith.constant 0 : index
      %c0_28 = arith.constant 0 : index
      %c0_29 = arith.constant 0 : index
      %50 = vector.load %arg6[%c0_27, %c0_28, %c0_29] : memref<1x8x128xf32, #tpu.memory_space<vmem>>, vector<1x8x128xf32>
      %51 = vector.shape_cast %50 : vector<1x8x128xf32> to vector<8x128xf32>
      %52 = vector.shape_cast %49 : vector<8x128xf32> to vector<1x8x128xf32>
      tpu.vector_store %arg6[%c0_27, %c0_28, %c0_29], %52 {strides = array<i32>} : memref<1x8x128xf32, #tpu.memory_space<vmem>>, vector<1x8x128xf32>,
    } else {
    }
    %true = arith.constant true
    %11 = arith.xori %8, %true : i1
    %12 = arith.extui %11 : i1 to i32
    %c0_i32_4 = arith.constant 0 : i32
    %13 = arith.cmpi ne, %12, %c0_i32_4 : i32
    scf.if %13 {
      %14 = tpu.iota {dimensions = array<i32: 1>} : vector<8x128xi32>
      %c0_i32_5 = arith.constant 0 : i32
      %c256_i32_6 = arith.constant 256 : i32
      %15 = arith.muli %c0_i32_5, %c256_i32_6 : i32
      %16 = tpu.assume_multiple %15, 128 : i32
      %c256_i32_7 = arith.constant 256 : i32
      %17 = arith.muli %c0_i32_5, %c256_i32_7 : i32
      %c128_i32 = arith.constant 128 : i32
      %18 = arith.addi %17, %c128_i32 : i32
      %19 = tpu.assume_multiple %18, 128 : i32
      %c256_i32_8 = arith.constant 256 : i32
      %20 = arith.muli %c0_i32_5, %c256_i32_8 : i32
      %21 = arith.addi %5, %20 : i32
      %22 = vector.broadcast %21 : i32 to vector<8x128xi32>
      %23 = arith.addi %14, %22 : vector<8x128xi32>
      %c256_i32_9 = arith.constant 256 : i32
      %24 = vector.broadcast %c256_i32_9 : i32 to vector<8x128xi32>
      %25 = arith.cmpi slt, %23, %24 : vector<8x128xi32>
      %c256_i32_10 = arith.constant 256 : i32
      %26 = arith.muli %c0_i32_5, %c256_i32_10 : i32
      %27 = arith.addi %5, %26 : i32
      %c128_i32_11 = arith.constant 128 : i32
      %28 = arith.addi %27, %c128_i32_11 : i32
      %29 = vector.broadcast %28 : i32 to vector<8x128xi32>
      %30 = arith.addi %14, %29 : vector<8x128xi32>
      %c256_i32_12 = arith.constant 256 : i32
      %31 = vector.broadcast %c256_i32_12 : i32 to vector<8x128xi32>
      %32 = arith.cmpi slt, %30, %31 : vector<8x128xi32>
      %c0 = arith.constant 0 : index
      %33 = arith.index_cast %16 : i32 to index
      %34 = vector.load %arg2[%c0, %33] : memref<8x256xf32, #tpu.memory_space<vmem>>, vector<8x128xf32>
      %cst_13 = arith.constant 0.000000e+00 : f32
      %35 = vector.broadcast %cst_13 : f32 to vector<8x128xf32>
      %36 = arith.select %25, %34, %35 : vector<8x128xi1>, vector<8x128xf32>
      %c0_14 = arith.constant 0 : index
      %37 = arith.index_cast %16 : i32 to index
      %38 = vector.load %arg3[%c0_14, %37] : memref<8x256xf32, #tpu.memory_space<vmem>>, vector<8x128xf32>
      %cst_15 = arith.constant 0.000000e+00 : f32
      %39 = vector.broadcast %cst_15 : f32 to vector<8x128xf32>
      %40 = arith.select %25, %38, %39 : vector<8x128xi1>, vector<8x128xf32>
      %c0_16 = arith.constant 0 : index
      %41 = arith.index_cast %19 : i32 to index
      %42 = vector.load %arg2[%c0_16, %41] : memref<8x256xf32, #tpu.memory_space<vmem>>, vector<8x128xf32>
      %cst_17 = arith.constant 0.000000e+00 : f32
      %43 = vector.broadcast %cst_17 : f32 to vector<8x128xf32>
      %44 = arith.select %32, %42, %43 : vector<8x128xi1>, vector<8x128xf32>
      %c0_18 = arith.constant 0 : index
      %45 = arith.index_cast %19 : i32 to index
      %46 = vector.load %arg3[%c0_18, %45] : memref<8x256xf32, #tpu.memory_space<vmem>>, vector<8x128xf32>
      %cst_19 = arith.constant 0.000000e+00 : f32
      %47 = vector.broadcast %cst_19 : f32 to vector<8x128xf32>
      %48 = arith.select %32, %46, %47 : vector<8x128xi1>, vector<8x128xf32>
      %49 = arith.addf %40, %48 : vector<8x128xf32>
      %50 = arith.addf %6, %49 : vector<8x128xf32>
      %51 = arith.mulf %36, %40 : vector<8x128xf32>
      %52 = arith.mulf %44, %48 : vector<8x128xf32>
      %53 = arith.addf %51, %52 : vector<8x128xf32>
      %54 = arith.addf %6, %53 : vector<8x128xf32>
      %55 = arith.addf %36, %44 : vector<8x128xf32>
      %56 = arith.addf %6, %55 : vector<8x128xf32>
      %c1_i32_20 = arith.constant 1 : i32
      %c0_21 = arith.constant 0 : index
      %c0_22 = arith.constant 0 : index
      %c0_23 = arith.constant 0 : index
      %57 = vector.load %arg4[%c0_21, %c0_22, %c0_23] : memref<1x8x128xf32, #tpu.memory_space<vmem>>, vector<1x8x128xf32>
      %58 = vector.shape_cast %57 : vector<1x8x128xf32> to vector<8x128xf32>
      %59 = arith.addf %58, %50 : vector<8x128xf32>
      %c0_24 = arith.constant 0 : index
      %c0_25 = arith.constant 0 : index
      %c0_26 = arith.constant 0 : index
      %60 = vector.load %arg4[%c0_24, %c0_25, %c0_26] : memref<1x8x128xf32, #tpu.memory_space<vmem>>, vector<1x8x128xf32>
      %61 = vector.shape_cast %60 : vector<1x8x128xf32> to vector<8x128xf32>
      %62 = vector.shape_cast %59 : vector<8x128xf32> to vector<1x8x128xf32>
      tpu.vector_store %arg4[%c0_24, %c0_25, %c0_26], %62 {strides = array<i32>} : memref<1x8x128xf32, #tpu.memory_space<vmem>>, vector<1x8x128xf32>,
      %c0_27 = arith.constant 0 : index
      %c0_28 = arith.constant 0 : index
      %c0_29 = arith.constant 0 : index
      %63 = vector.load %arg5[%c0_27, %c0_28, %c0_29] : memref<1x8x128xf32, #tpu.memory_space<vmem>>, vector<1x8x128xf32>
      %64 = vector.shape_cast %63 : vector<1x8x128xf32> to vector<8x128xf32>
      %65 = arith.addf %64, %54 : vector<8x128xf32>
      %c0_30 = arith.constant 0 : index
      %c0_31 = arith.constant 0 : index
      %c0_32 = arith.constant 0 : index
      %66 = vector.load %arg5[%c0_30, %c0_31, %c0_32] : memref<1x8x128xf32, #tpu.memory_space<vmem>>, vector<1x8x128xf32>
      %67 = vector.shape_cast %66 : vector<1x8x128xf32> to vector<8x128xf32>
      %68 = vector.shape_cast %65 : vector<8x128xf32> to vector<1x8x128xf32>
      tpu.vector_store %arg5[%c0_30, %c0_31, %c0_32], %68 {strides = array<i32>} : memref<1x8x128xf32, #tpu.memory_space<vmem>>, vector<1x8x128xf32>,
      %c0_33 = arith.constant 0 : index
      %c0_34 = arith.constant 0 : index
      %c0_35 = arith.constant 0 : index
      %69 = vector.load %arg6[%c0_33, %c0_34, %c0_35] : memref<1x8x128xf32, #tpu.memory_space<vmem>>, vector<1x8x128xf32>
      %70 = vector.shape_cast %69 : vector<1x8x128xf32> to vector<8x128xf32>
      %71 = arith.addf %70, %56 : vector<8x128xf32>
      %c0_36 = arith.constant 0 : index
      %c0_37 = arith.constant 0 : index
      %c0_38 = arith.constant 0 : index
      %72 = vector.load %arg6[%c0_36, %c0_37, %c0_38] : memref<1x8x128xf32, #tpu.memory_space<vmem>>, vector<1x8x128xf32>
      %73 = vector.shape_cast %72 : vector<1x8x128xf32> to vector<8x128xf32>
      %74 = vector.shape_cast %71 : vector<8x128xf32> to vector<1x8x128xf32>
      tpu.vector_store %arg6[%c0_36, %c0_37, %c0_38], %74 {strides = array<i32>} : memref<1x8x128xf32, #tpu.memory_space<vmem>>, vector<1x8x128xf32>,
    } else {
    }
    return
  }
  func.func @transform_0(%arg0: i32, %arg1: i32) -> (i32, i32) {
    %c1_i32 = arith.constant 1 : i32
    %0 = arith.muli %arg0, %c1_i32 : i32
    %1 = arith.addi %0, %arg1 : i32
    %c0_i32 = arith.constant 0 : i32
    %2 = arith.minsi %1, %c0_i32 : i32
    %c0_i32_0 = arith.constant 0 : i32
    %c0_i32_1 = arith.constant 0 : i32
    return %c0_i32_0, %2 : i32, i32
  }
  func.func @transform_1(%arg0: i32, %arg1: i32) -> (i32, i32) {
    %c1_i32 = arith.constant 1 : i32
    %0 = arith.muli %arg0, %c1_i32 : i32
    %1 = arith.addi %0, %arg1 : i32
    %c0_i32 = arith.constant 0 : i32
    %2 = arith.minsi %1, %c0_i32 : i32
    %c0_i32_0 = arith.constant 0 : i32
    %c0_i32_1 = arith.constant 0 : i32
    return %c0_i32_0, %2 : i32, i32
  }
  func.func @transform_2(%arg0: i32, %arg1: i32) -> (i32, i32, i32) {
    %c0_i32 = arith.constant 0 : i32
    %c0_i32_0 = arith.constant 0 : i32
    %c0_i32_1 = arith.constant 0 : i32
    return %arg0, %c0_i32, %c0_i32_0 : i32, i32, i32
  }
  func.func @transform_3(%arg0: i32, %arg1: i32) -> (i32, i32, i32) {
    %c0_i32 = arith.constant 0 : i32
    %c0_i32_0 = arith.constant 0 : i32
    %c0_i32_1 = arith.constant 0 : i32
    return %arg0, %c0_i32, %c0_i32_0 : i32, i32, i32
  }
  func.func @transform_4(%arg0: i32, %arg1: i32) -> (i32, i32, i32) {
    %c0_i32 = arith.constant 0 : i32
    %c0_i32_0 = arith.constant 0 : i32
    %c0_i32_1 = arith.constant 0 : i32
    return %arg0, %c0_i32, %c0_i32_0 : i32, i32, i32
  }
}

</mosaic_0001>

<bundles_post_ra>
// kernel: tpu_custom_call.1
= control target key start
LH: loop header
LB: loop body
LE: loop exit
PB: predicated region body
PF: predicated region fallthrough
CT: control target
= control target key end

     0   :  { %10 = vsyncpa [#allocation3], 0  ;;  %s373_s0 = inlined_call_operand.hbm [shape: f32[8,256], index: 0, kind: input, shape index: {}]   ;;  %s374_s1 = inlined_call_operand.hbm [shape: f32[8,256], index: 1, kind: input, shape index: {}]   ;;  %s375_s2 = inlined_call_operand.hbm [shape: f32[1,8,128], index: 2, kind: output, shape index: {0}]   ;;  %s376_s3 = inlined_call_operand.hbm [shape: f32[1,8,128], index: 3, kind: output, shape index: {1}]   ;;  %s377_s4 = inlined_call_operand.hbm [shape: f32[1,8,128], index: 4, kind: output, shape index: {2}]  }
   0x1   :  { %11 = vsyncpa [#allocation6], 0 }
   0x2   :  { %12 = vsyncpa [#allocation4], 0 }
   0x3   :  { %13 = vsyncpa [#allocation9], 0  ;;  %s25_s17 = sshll.u32 %s373_s0, 4  ;;  %s328_s18 = smov [#allocation2]   ;;  %s26_s17 = int_to_ptr.hbm [resolvable:$true] %s25_s17 }
   0x4   :  { %s27_s19 = sshll.u32 %s328_s18, 4  ;;  %s42_s22 = sshll.u32 %s374_s1, 4  ;;  %s28_s19 = int_to_ptr.vmem [resolvable:$true] %s27_s19  ;;  %s43_s22 = int_to_ptr.hbm [resolvable:$true] %s42_s22 }
   0x5   :  { %30 = dma.hbm_to_vmem [thread:$0]  %s26_s17, 256, %s28_s19, [#allocation3]  }
   0x6   :  { %s329_s23 = smov [#allocation5]  }
   0x7   :  { %s44_s24 = sshll.u32 %s329_s23, 4  ;;  %s45_s24 = int_to_ptr.vmem [resolvable:$true] %s44_s24 }
   0x8   :  { %47 = dma.hbm_to_vmem [thread:$0]  %s43_s22, 256, %s45_s24, [#allocation6]  }
   0x9   :  { %320 = dma.done.wait [#allocation3], 256  }
   0xa   :  { %321 = vsyncadd [#allocation3], 4294967040 }
   0xb   :  { %322 = dma.done.wait [#allocation6], 256  }
   0xc   :  { %323 = vsyncadd [#allocation6], 4294967040  ;;  %v78_v0 = vld [vmem:[#allocation2] sm:$0xff]  ;;  %v79_v1 = vld [vmem:[#allocation5] sm:$0xff]  ;;  %s330_s0 = smov [#allocation7]   ;;  %s148_s27 = sshll.u32 %s375_s2, 4  ;;  %s149_s27 = int_to_ptr.hbm [resolvable:$true] %s148_s27 }
   0xd   :  { %v81_v2 = vld [vmem:[#allocation2 + $0x8] sm:$0xff]  ;;  %v83_v3 = vld [vmem:[#allocation5 + $0x8] sm:$0xff]  ;;  %v86_v4 = vmul.f32 %v79_v1, %v78_v0  ;;  %s146_s25 = sshll.u32 %s330_s0, 4  ;;  %s331_s28 = smov [#allocation8]   ;;  %s147_s25 = int_to_ptr.vmem [resolvable:$true] %s146_s25 }
   0xe   :  { %v90_v5 = vadd.f32 %v81_v2, %v78_v0  ;;  %v87_v6 = vmul.f32 %v83_v3, %v81_v2  ;;  %v84_v7 = vadd.f32 %v83_v3, %v79_v1  ;;  %s157_s29 = sshll.u32 %s331_s28, 4  ;;  %s159_s6 = sshll.u32 %s376_s3, 4  ;;  %s158_s29 = int_to_ptr.vmem [resolvable:$true] %s157_s29  ;;  %s160_s6 = int_to_ptr.hbm [resolvable:$true] %s159_s6 }
   0xf   :  { %s332_s7 = smov [#allocation10]   ;;  %s170_s11 = sshll.u32 %s377_s4, 4  ;;  %s171_s11 = int_to_ptr.hbm [resolvable:$true] %s170_s11 }
  0x10   :  { %s168_s8 = sshll.u32 %s332_s7, 4  ;;  %v88_v8 = vadd.f32 %v87_v6, %v86_v4  ;;  %100 = vst [vmem:[#allocation10] sm:$0xff] %v90_v5  ;;  %s169_s8 = int_to_ptr.vmem [resolvable:$true] %s168_s8 }
  0x11   :  { %94 = vst [vmem:[#allocation7] sm:$0xff] %v84_v7 }
  0x12   :  { %151 = dma.vmem_to_hbm [thread:$0]  %s147_s25, 128, %s149_s27, [#allocation4]   ;;  %97 = vst [vmem:[#allocation8] sm:$0xff] %v88_v8 }
  0x13   :  { %162 = dma.vmem_to_hbm [thread:$0]  %s158_s29, 128, %s160_s6, [#allocation9]  }
  0x14   :  { %173 = dma.vmem_to_hbm [thread:$0]  %s169_s8, 128, %s171_s11, [#allocation9]  }
  0x15   :  { %324 = dma.done.wait [#allocation4], 128  }
  0x16   :  { %325 = vsyncadd [#allocation4], 4294967168 }
  0x17   :  { %326 = dma.done.wait [#allocation9], 256  }
  0x18   :  { %327 = vsyncadd [#allocation9], 4294967040 }
  0x19   :  { %186 = vsyncpa [#allocation3], 1 }
  0x1a   :  { %187 = vsyncpa [#allocation6], 1 }
  0x1b   :  { %188 = vsyncpa [#allocation4], 1 }
  0x1c   :  { %189 = vsyncpa [#allocation9], 1 }

</bundles_post_ra>
